<compile_context>
chip_gen: v5e
topology: v5e:2x2
jax: 0.10.0
libtpu: 0.0.40
codegen_flags: <defaults>
</compile_context>

<pallas_src>
import math

import jax
import jax.numpy as jnp
from jax.experimental import pallas as pl
from jax.experimental.pallas import tpu as pltpu


def _add_kernel(a_ref, b_ref, o_ref):
    """Element-wise add of one (ROW_TILE, LANE) tile (pure VPU work)."""
    o_ref[...] = a_ref[...] + b_ref[...]


def _choose_layout(total):
    """Pick a lane-dense (rows, lane, padded_total) factorization."""
    for lane in (512, 256, 128):
        if total % lane == 0:
            return total // lane, lane, total
    # Pad up to a multiple of 128 so stores stay unmasked / lane-dense.
    lane = 128
    padded = ((total + lane - 1) // lane) * lane
    return padded // lane, lane, padded


def _pallas_add(a, b):
    """Element-wise a + b via Pallas with a lane-dense (rows, lane) layout."""
    assert a.shape == b.shape, (a.shape, b.shape)
    assert a.dtype == b.dtype, (a.dtype, b.dtype)
    orig_shape = a.shape
    total = math.prod(orig_shape)

    rows, lane, padded_total = _choose_layout(total)

    a_flat = a.reshape(-1)
    b_flat = b.reshape(-1)
    if padded_total != total:
        pad = padded_total - total
        a_flat = jnp.pad(a_flat, (0, pad))
        b_flat = jnp.pad(b_flat, (0, pad))

    a2 = a_flat.reshape(rows, lane)
    b2 = b_flat.reshape(rows, lane)

    # Keep (3 arrays x 2 buffers x tile) around <=12 MiB so it fits the
    # default scoped-VMEM limit on every chip generation.
    itemsize = jnp.dtype(a.dtype).itemsize
    max_tile_elems = (12 * 1024 * 1024) // (6 * itemsize)
    row_tile = max(1, min(rows, max_tile_elems // lane))
    if row_tile < rows:
        # Tiled path: round down to a sublane multiple for clean (8,128) tiles.
        row_tile = max(8, (row_tile // 8) * 8)
    grid = (pl.cdiv(rows, row_tile),)

    out = pl.pallas_call(
        _add_kernel,
        out_shape=jax.ShapeDtypeStruct((rows, lane), a.dtype),
        grid_spec=pltpu.PrefetchScalarGridSpec(
            num_scalar_prefetch=0,
            grid=grid,
            in_specs=[
                pl.BlockSpec((row_tile, lane), lambda i: (i, 0)),
                pl.BlockSpec((row_tile, lane), lambda i: (i, 0)),
            ],
            out_specs=pl.BlockSpec((row_tile, lane), lambda i: (i, 0)),
        ),
        compiler_params=pltpu.CompilerParams(
            dimension_semantics=("parallel",),
            vmem_limit_bytes=64 << 20,
        ),
        cost_estimate=pl.CostEstimate(
            flops=padded_total,
            transcendentals=0,
            bytes_accessed=3 * padded_total * itemsize,
        ),
    )(a2, b2)

    out_flat = out.reshape(-1)
    if padded_total != total:
        out_flat = out_flat[:total]
    return out_flat.reshape(orig_shape)


def add2(x, index):
    """Pallas equivalent of Add2.forward.

    x: tuple (a, (b0, b1)) of arrays; index: static Python int (0 or 1),
    matching the PyTorch module where `index` is a constructor argument.
    """
    a = x[0]
    if index == 0:
        b = x[1][0]
    elif index == 1:
        b = x[1][1]
    else:
        raise ValueError(f"Add2 only supports index in (0, 1), got {index}")
    return _pallas_add(a, b)


if __name__ == "__main__":
    # Small deterministic example consistent with the module's usage on CNN
    # feature maps: (batch=2, channels=4, H=16, W=16).
    key = jax.random.PRNGKey(0)
    k0, k1, k2 = jax.random.split(key, 3)
    a = jax.random.normal(k0, (2, 4, 16, 16), jnp.float32)
    b0 = jax.random.normal(k1, (2, 4, 16, 16), jnp.float32)
    b1 = jax.random.normal(k2, (2, 4, 16, 16), jnp.float32)
    x = (a, (b0, b1))

    out0 = jax.block_until_ready(add2(x, index=0))
    out1 = jax.block_until_ready(add2(x, index=1))

    assert out0.shape == a.shape and out1.shape == a.shape
    assert jnp.allclose(out0, a + b0, atol=1e-6, rtol=1e-6), "index=0 mismatch"
    assert jnp.allclose(out1, a + b1, atol=1e-6, rtol=1e-6), "index=1 mismatch"

    print("KERNEL_OK")
</pallas_src>

<mosaic_0001>
module attributes {stable_mosaic.version = 11 : i64} {
  func.func @_add_kernel(%arg0: i32, %arg1: memref<4x512xf32, #tpu.memory_space<vmem>>, %arg2: memref<4x512xf32, #tpu.memory_space<vmem>>, %arg3: memref<4x512xf32, #tpu.memory_space<vmem>>) attributes {dimension_semantics = [#tpu.dimension_semantics<parallel>], iteration_bounds = array<i64: 1>, scalar_prefetch = 0 : i64, scratch_operands = 0 : i64, tpu.core_type = #tpu.core_type<tc>, window_params = [{transform_indices = @transform_0, window_bounds = array<i64: 4, 512>}, {transform_indices = @transform_1, window_bounds = array<i64: 4, 512>}, {transform_indices = @transform_2, window_bounds = array<i64: 4, 512>}]} {
    %c0 = arith.constant 0 : index
    %c0_0 = arith.constant 0 : index
    %0 = vector.load %arg1[%c0, %c0_0] : memref<4x512xf32, #tpu.memory_space<vmem>>, vector<4x512xf32>
    %c0_1 = arith.constant 0 : index
    %c0_2 = arith.constant 0 : index
    %1 = vector.load %arg2[%c0_1, %c0_2] : memref<4x512xf32, #tpu.memory_space<vmem>>, vector<4x512xf32>
    %2 = arith.addf %0, %1 : vector<4x512xf32>
    %c0_3 = arith.constant 0 : index
    %c0_4 = arith.constant 0 : index
    %3 = vector.load %arg3[%c0_3, %c0_4] : memref<4x512xf32, #tpu.memory_space<vmem>>, vector<4x512xf32>
    tpu.vector_store %arg3[%c0_3, %c0_4], %2 {strides = array<i32>} : memref<4x512xf32, #tpu.memory_space<vmem>>, vector<4x512xf32>,
    return
  }
  func.func @transform_0(%arg0: i32) -> (i32, i32) {
    %c0_i32 = arith.constant 0 : i32
    %c0_i32_0 = arith.constant 0 : i32
    return %arg0, %c0_i32 : i32, i32
  }
  func.func @transform_1(%arg0: i32) -> (i32, i32) {
    %c0_i32 = arith.constant 0 : i32
    %c0_i32_0 = arith.constant 0 : i32
    return %arg0, %c0_i32 : i32, i32
  }
  func.func @transform_2(%arg0: i32) -> (i32, i32) {
    %c0_i32 = arith.constant 0 : i32
    %c0_i32_0 = arith.constant 0 : i32
    return %arg0, %c0_i32 : i32, i32
  }
}

</mosaic_0001>

<bundles_post_ra>
// kernel: tpu_custom_call.1
= control target key start
LH: loop header
LB: loop body
LE: loop exit
PB: predicated region body
PF: predicated region fallthrough
CT: control target
= control target key end

     0   :  { %7 = vsyncpa [#allocation3], 0  ;;  %s174_s0 = inlined_call_operand.hbm [shape: f32[4,512], index: 0, kind: input, shape index: {}]   ;;  %s175_s1 = inlined_call_operand.hbm [shape: f32[4,512], index: 1, kind: input, shape index: {}]   ;;  %s176_s2 = inlined_call_operand.hbm [shape: f32[4,512], index: 2, kind: output, shape index: {}]  }
   0x1   :  { %8 = vsyncpa [#allocation6], 0 }
   0x2   :  { %9 = vsyncpa [#allocation4], 0  ;;  %s15_s11 = sshll.u32 %s174_s0, 4  ;;  %s147_s12 = smov [#allocation2]   ;;  %s16_s11 = int_to_ptr.hbm [resolvable:$true] %s15_s11 }
   0x3   :  { %s17_s13 = sshll.u32 %s147_s12, 4  ;;  %s26_s16 = sshll.u32 %s175_s1, 4  ;;  %s18_s13 = int_to_ptr.vmem [resolvable:$true] %s17_s13  ;;  %s27_s16 = int_to_ptr.hbm [resolvable:$true] %s26_s16 }
   0x4   :  { %20 = dma.hbm_to_vmem [thread:$0]  %s16_s11, 256, %s18_s13, [#allocation3]  }
   0x5   :  { %s148_s17 = smov [#allocation5]  }
   0x6   :  { %s28_s18 = sshll.u32 %s148_s17, 4  ;;  %s29_s18 = int_to_ptr.vmem [resolvable:$true] %s28_s18 }
   0x7   :  { %31 = dma.hbm_to_vmem [thread:$0]  %s27_s16, 256, %s29_s18, [#allocation6]  }
   0x8   :  { %141 = dma.done.wait [#allocation3], 256  }
   0x9   :  { %142 = vsyncadd [#allocation3], 4294967040 }
   0xa   :  { %143 = dma.done.wait [#allocation6], 256  }
   0xb   :  { %144 = vsyncadd [#allocation6], 4294967040  ;;  %s149_s19 = smov [#allocation7]   ;;  %s55_s22 = sshll.u32 %s176_s2, 4  ;;  %v40_v0 = vld [vmem:[#allocation2] sm:$0xff]  ;;  %v42_v1 = vld [vmem:[#allocation5] sm:$0xff]  ;;  %s56_s22 = int_to_ptr.hbm [resolvable:$true] %s55_s22 }
   0xc   :  { %s53_s0 = sshll.u32 %s149_s19, 4  ;;  %v41_v2 = vld [vmem:[#allocation2 + $0x8] sm:$0xff]  ;;  %v44_v3 = vadd.f32 %v42_v1, %v40_v0  ;;  %v43_v4 = vld [vmem:[#allocation5 + $0x8] sm:$0xff]  ;;  %s54_s0 = int_to_ptr.vmem [resolvable:$true] %s53_s0 }
   0xd   :  { %v45_v5 = vadd.f32 %v43_v4, %v41_v2 }
   0xe   :  { %46 = vst [vmem:[#allocation7] sm:$0xff] %v44_v3 }
   0xf   :  { %47 = vst [vmem:[#allocation7 + $0x8] sm:$0xff] %v45_v5 }
  0x10   :  { %58 = dma.vmem_to_hbm [thread:$0]  %s54_s0, 256, %s56_s22, [#allocation4]  }
  0x11   :  { %145 = dma.done.wait [#allocation4], 256  }
  0x12   :  { %146 = vsyncadd [#allocation4], 4294967040 }
  0x13   :  { %63 = vsyncpa [#allocation3], 1 }
  0x14   :  { %64 = vsyncpa [#allocation6], 1 }
  0x15   :  { %65 = vsyncpa [#allocation4], 1 }

</bundles_post_ra>
